<compile_context>
chip_gen: v6e
topology: v6e:2x2x1
jax: 0.10.0
libtpu: 0.0.40
codegen_flags: <defaults>
</compile_context>

<pallas_src>
import functools

import jax
import jax.numpy as jnp
from jax.experimental import pallas as pl
from jax.experimental.pallas import tpu as pltpu


# ---------------------------------------------------------------------------
# Pallas kernel: one grid step == one graph of the batch. All per-graph blocks
# fit in VMEM; the two weight slabs stay resident across the whole grid.
#
#   z_e   = X_e @ W_rel_e          (3 small matmuls into row-slices of scratch)
#   h     = A_cat @ Z              (fused scatter-add aggregation, one MXU op)
#   h     = relu(h + X_tgt @ W_root_sum + b_rel_sum)
#   out   = h @ (W_mlp @ W_lin) + (b_mlp @ W_lin + b_lin)   (folded, 128-lane pad)
# ---------------------------------------------------------------------------
def hetero_gnn_kernel(a_ref, x_ref, wconv_ref, wout_ref, out_ref, z_ref,
                      *, n_app, n_non, n_obs):
  f = x_ref.shape[2]
  n_src = n_app + n_non + n_obs
  h_dim = wout_ref.shape[0] - 1

  x = x_ref[0]            # [N_all, F]   (rows: app | non_app | obs | target)
  w = wconv_ref[...]      # [4F+1, H]    (rows: Wrel_app | Wrel_non | Wrel_obs |
                          #               sum_e Wroot_e | sum_e brel_e)

  # Per-edge-type relational transforms -> row blocks of the Z scratch.
  z_ref[0:n_app, :] = jnp.dot(
      x[0:n_app, :], w[0:f, :], preferred_element_type=jnp.float32)
  z_ref[n_app:n_app + n_non, :] = jnp.dot(
      x[n_app:n_app + n_non, :], w[f:2 * f, :],
      preferred_element_type=jnp.float32)
  z_ref[n_app + n_non:n_src, :] = jnp.dot(
      x[n_app + n_non:n_src, :], w[2 * f:3 * f, :],
      preferred_element_type=jnp.float32)

  # Fused aggregation over all three edge types:
  #   h[dst] = sum_e sum_src A_e[dst, src] * (X_e @ W_rel_e)[src]
  h = jnp.dot(a_ref[0], z_ref[...], preferred_element_type=jnp.float32)

  # Folded root transform (sum of the 3 lin_root weights) + summed rel bias.
  h = h + jnp.dot(x[n_src:, :], w[3 * f:4 * f, :],
                  preferred_element_type=jnp.float32)
  h = jnp.maximum(h + w[4 * f:4 * f + 1, :], 0.0)               # F.relu

  # mlp ∘ lin folded into one affine map (output padded to lane-dense width).
  out_ref[0] = (jnp.dot(h, wout_ref[0:h_dim, :],
                        preferred_element_type=jnp.float32)
                + wout_ref[h_dim:h_dim + 1, :])


@functools.partial(jax.jit,
                   static_argnames=("n_app", "n_non", "n_obs", "out_channels"))
def hetero_gnn_forward(a_cat, x_all, w_conv, w_out, *,
                       n_app, n_non, n_obs, out_channels):
  """a_cat:  [B, Nt, Nsrc]   concatenated dense adjacencies (edge counts)
     x_all:  [B, Nsrc+Nt, F] stacked node features (app | non_app | obs | target)
     w_conv: [4F+1, H]       packed conv weights (see pack_params)
     w_out:  [H+1, Cpad]     packed mlp∘lin weights, zero-padded to 128 lanes"""
  batch, n_tgt, n_src = a_cat.shape
  n_all, f = x_all.shape[1], x_all.shape[2]
  h_dim = w_conv.shape[1]
  c_pad = w_out.shape[1]

  kernel = functools.partial(hetero_gnn_kernel,
                             n_app=n_app, n_non=n_non, n_obs=n_obs)

  flops = 2 * batch * (n_src * f * h_dim          # per-type Z matmuls
                       + n_tgt * n_src * h_dim    # fused aggregation
                       + n_tgt * f * h_dim        # folded root
                       + n_tgt * h_dim * c_pad)   # folded mlp @ lin
  bytes_accessed = 4 * (a_cat.size + x_all.size + w_conv.size + w_out.size
                        + batch * n_tgt * c_pad)

  out = pl.pallas_call(
      kernel,
      out_shape=jax.ShapeDtypeStruct((batch, n_tgt, c_pad), jnp.float32),
      grid_spec=pltpu.PrefetchScalarGridSpec(
          num_scalar_prefetch=0,
          grid=(batch,),
          in_specs=[
              pl.BlockSpec((1, n_tgt, n_src), lambda b: (b, 0, 0)),
              pl.BlockSpec((1, n_all, f), lambda b: (b, 0, 0)),
              # Weight slabs: constant block index -> VMEM-resident across grid.
              pl.BlockSpec((w_conv.shape[0], h_dim), lambda b: (0, 0)),
              pl.BlockSpec((h_dim + 1, c_pad), lambda b: (0, 0)),
          ],
          out_specs=pl.BlockSpec((1, n_tgt, c_pad), lambda b: (b, 0, 0)),
          scratch_shapes=[pltpu.VMEM((n_src, h_dim), jnp.float32)],
      ),
      compiler_params=pltpu.CompilerParams(
          dimension_semantics=("parallel",)),
      cost_estimate=pl.CostEstimate(flops=flops, transcendentals=0,
                                    bytes_accessed=bytes_accessed),
  )(a_cat, x_all, w_conv, w_out)
  return out[..., :out_channels]


# ---------------------------------------------------------------------------
# One-time parameter packing (algebraic folds; done at model-load time).
# ---------------------------------------------------------------------------
def pack_params(params, lane_pad=128):
  h = params["wrel_app"].shape[1]
  w_root_sum = params["wroot_app"] + params["wroot_non"] + params["wroot_obs"]
  b_rel_sum = params["brel_app"] + params["brel_non"] + params["brel_obs"]
  w_conv = jnp.concatenate(
      [params["wrel_app"], params["wrel_non"], params["wrel_obs"],
       w_root_sum, b_rel_sum], axis=0)                       # [4F+1, H]

  w_ml = params["w_mlp"] @ params["w_lin"]                   # exact: no nonlinearity
  b_ml = params["b_mlp"] @ params["w_lin"] + params["b_lin"]
  c = w_ml.shape[1]
  c_pad = ((c + lane_pad - 1) // lane_pad) * lane_pad        # lane-dense output
  w_out = jnp.zeros((h + 1, c_pad), jnp.float32)
  w_out = w_out.at[:h, :c].set(w_ml)
  w_out = w_out.at[h, :c].set(b_ml[0])
  return {"w_conv": w_conv, "w_out": w_out}


# ---------------------------------------------------------------------------
# Batched input packing (data prep, done once, outside the jitted forward).
# ---------------------------------------------------------------------------
def pack_inputs(adjs, x_dict):
  """adjs: (a_app, a_non, a_obs) each [B, Nt, N_e];
     x_dict: (x_app, x_non, x_obs, x_tgt) each [B, N_e, F]."""
  a_cat = jnp.concatenate(adjs, axis=2)       # [B, Nt, Nsrc]   (no zero padding)
  x_all = jnp.concatenate(x_dict, axis=1)     # [B, Nsrc+Nt, F] (no zero padding)
  return a_cat, x_all


# ---------------------------------------------------------------------------
# Pure-JAX reference in the ORIGINAL (unfused) form, for a correctness check.
# ---------------------------------------------------------------------------
def hetero_gnn_reference(adjs, x_dict, params):
  a_app, a_non, a_obs = adjs
  x_app, x_non, x_obs, x_tgt = x_dict

  def gc(a, xs, wrel, brel, wroot):
    return (a @ xs) @ wrel + brel + x_tgt @ wroot

  h = (gc(a_app, x_app, params["wrel_app"], params["brel_app"], params["wroot_app"])
       + gc(a_non, x_non, params["wrel_non"], params["brel_non"], params["wroot_non"])
       + gc(a_obs, x_obs, params["wrel_obs"], params["brel_obs"], params["wroot_obs"]))
  h = jnp.maximum(h, 0.0)
  y = h @ params["w_mlp"] + params["b_mlp"]
  return y @ params["w_lin"] + params["b_lin"]


# ---------------------------------------------------------------------------
# Deterministic setup (synthetic parameters + synthetic hetero graphs).
# ---------------------------------------------------------------------------
def make_params(key, num_features, hidden, out_channels):
  def lin_w(k, fan_in, fan_out):
    scale = 1.0 / jnp.sqrt(jnp.float32(fan_in))
    return jax.random.uniform(k, (fan_in, fan_out), jnp.float32, -scale, scale)

  keys = jax.random.split(key, 16)
  params = {}
  for i, name in enumerate(["app", "non", "obs"]):
    params[f"wrel_{name}"] = lin_w(keys[3 * i + 0], num_features, hidden)
    params[f"brel_{name}"] = 0.01 * jax.random.normal(
        keys[3 * i + 1], (1, hidden), jnp.float32)
    params[f"wroot_{name}"] = lin_w(keys[3 * i + 2], num_features, hidden)
  params["w_mlp"] = lin_w(keys[9], hidden, hidden)
  params["b_mlp"] = 0.01 * jax.random.normal(keys[10], (1, hidden), jnp.float32)
  params["w_lin"] = lin_w(keys[11], hidden, out_channels)
  params["b_lin"] = 0.01 * jax.random.normal(keys[12], (1, out_channels), jnp.float32)
  return params


def dense_adjacency(key, n_dst, n_src, n_edges):
  ks, kd = jax.random.split(key)
  src = jax.random.randint(ks, (n_edges,), 0, n_src)
  dst = jax.random.randint(kd, (n_edges,), 0, n_dst)
  # multi-edge counts -> identical to PyG scatter-add aggregation over edge_index
  return jnp.zeros((n_dst, n_src), jnp.float32).at[dst, src].add(1.0)


if __name__ == "__main__":
  NUM_FEATURES = 16
  HIDDEN = 32
  OUT_CHANNELS = 8
  N_TARGET, N_APP, N_NON, N_OBS = 16, 16, 8, 16
  N_EDGES = 48
  BATCH = 4

  root = jax.random.PRNGKey(0)
  k_par, k_data = jax.random.split(root)

  params = make_params(k_par, NUM_FEATURES, HIDDEN, OUT_CHANNELS)
  packed = pack_params(params)

  xa, xn, xo, xt, aa, an, ao = [], [], [], [], [], [], []
  for kb in jax.random.split(k_data, BATCH):
    ks = jax.random.split(kb, 7)
    xa.append(jax.random.normal(ks[0], (N_APP, NUM_FEATURES), jnp.float32))
    xn.append(jax.random.normal(ks[1], (N_NON, NUM_FEATURES), jnp.float32))
    xo.append(jax.random.normal(ks[2], (N_OBS, NUM_FEATURES), jnp.float32))
    xt.append(jax.random.normal(ks[3], (N_TARGET, NUM_FEATURES), jnp.float32))
    aa.append(dense_adjacency(ks[4], N_TARGET, N_APP, N_EDGES))
    an.append(dense_adjacency(ks[5], N_TARGET, N_NON, N_EDGES))
    ao.append(dense_adjacency(ks[6], N_TARGET, N_OBS, N_EDGES))

  x_app, x_non, x_obs, x_tgt = map(jnp.stack, (xa, xn, xo, xt))
  a_app, a_non, a_obs = map(jnp.stack, (aa, an, ao))

  a_cat, x_all = pack_inputs((a_app, a_non, a_obs),
                             (x_app, x_non, x_obs, x_tgt))

  out = hetero_gnn_forward(a_cat, x_all, packed["w_conv"], packed["w_out"],
                           n_app=N_APP, n_non=N_NON, n_obs=N_OBS,
                           out_channels=OUT_CHANNELS)
  out = jax.block_until_ready(out)
  assert out.shape == (BATCH, N_TARGET, OUT_CHANNELS)

  for b in range(BATCH):
    ref = hetero_gnn_reference(
        (a_app[b], a_non[b], a_obs[b]),
        (x_app[b], x_non[b], x_obs[b], x_tgt[b]), params)
    assert jnp.allclose(out[b], ref, atol=2e-4, rtol=2e-4), f"mismatch graph {b}"

  print("KERNEL_OK")
</pallas_src>

<mosaic_0001>
module attributes {stable_mosaic.version = 11 : i64} {
  func.func @hetero_gnn_kernel(%arg0: i32, %arg1: memref<1x16x40xf32, #tpu.memory_space<vmem>>, %arg2: memref<1x56x16xf32, #tpu.memory_space<vmem>>, %arg3: memref<65x32xf32, #tpu.memory_space<vmem>>, %arg4: memref<33x128xf32, #tpu.memory_space<vmem>>, %arg5: memref<1x16x128xf32, #tpu.memory_space<vmem>>, %arg6: memref<40x32xf32, #tpu.memory_space<vmem>>) attributes {dimension_semantics = [#tpu.dimension_semantics<parallel>], iteration_bounds = array<i64: 4>, scalar_prefetch = 0 : i64, scratch_operands = 1 : i64, tpu.core_type = #tpu.core_type<tc>, window_params = [{transform_indices = @transform_0, window_bounds = array<i64: 1, 16, 40>}, {transform_indices = @transform_1, window_bounds = array<i64: 1, 56, 16>}, {pipeline_mode = #tpu.pipeline_mode<synchronous>, transform_indices = @transform_2, window_bounds = array<i64: 65, 32>}, {pipeline_mode = #tpu.pipeline_mode<synchronous>, transform_indices = @transform_3, window_bounds = array<i64: 33, 128>}, {transform_indices = @transform_4, window_bounds = array<i64: 1, 16, 128>}]} {
    %c0 = arith.constant 0 : index
    %c0_0 = arith.constant 0 : index
    %c0_1 = arith.constant 0 : index
    %0 = vector.load %arg2[%c0, %c0_0, %c0_1] : memref<1x56x16xf32, #tpu.memory_space<vmem>>, vector<1x56x16xf32>
    %1 = vector.shape_cast %0 : vector<1x56x16xf32> to vector<56x16xf32>
    %c0_2 = arith.constant 0 : index
    %c0_3 = arith.constant 0 : index
    %2 = vector.load %arg3[%c0_2, %c0_3] : memref<65x32xf32, #tpu.memory_space<vmem>>, vector<65x32xf32>
    %3 = vector.extract_strided_slice %1 {offsets = [0, 0], sizes = [16, 16], strides = [1, 1]} : vector<56x16xf32> to vector<16x16xf32>
    %4 = vector.extract_strided_slice %2 {offsets = [0, 0], sizes = [16, 32], strides = [1, 1]} : vector<65x32xf32> to vector<16x32xf32>
    %cst = arith.constant dense<0.000000e+00> : vector<16x32xf32>
    %5 = tpu.matmul %3, %4, %cst {dimension_numbers = #tpu.dot_dimension_numbers<[1], [0], [0], [1], [0, 0, 1, 1], [], []>} : vector<16x16xf32>, vector<16x32xf32>, vector<16x32xf32> -> vector<16x32xf32>
    %c0_4 = arith.constant 0 : index
    %c0_5 = arith.constant 0 : index
    %6 = vector.load %arg6[%c0_4, %c0_5] : memref<40x32xf32, #tpu.memory_space<vmem>>, vector<16x32xf32>
    tpu.vector_store %arg6[%c0_4, %c0_5], %5 {strides = array<i32>} : memref<40x32xf32, #tpu.memory_space<vmem>>, vector<16x32xf32>,
    %7 = vector.extract_strided_slice %1 {offsets = [16, 0], sizes = [8, 16], strides = [1, 1]} : vector<56x16xf32> to vector<8x16xf32>
    %8 = vector.extract_strided_slice %2 {offsets = [16, 0], sizes = [16, 32], strides = [1, 1]} : vector<65x32xf32> to vector<16x32xf32>
    %cst_6 = arith.constant dense<0.000000e+00> : vector<8x32xf32>
    %9 = tpu.matmul %7, %8, %cst_6 {dimension_numbers = #tpu.dot_dimension_numbers<[1], [0], [0], [1], [0, 0, 1, 1], [], []>} : vector<8x16xf32>, vector<16x32xf32>, vector<8x32xf32> -> vector<8x32xf32>
    %c16 = arith.constant 16 : index
    %c0_7 = arith.constant 0 : index
    %10 = vector.load %arg6[%c16, %c0_7] : memref<40x32xf32, #tpu.memory_space<vmem>>, vector<8x32xf32>
    tpu.vector_store %arg6[%c16, %c0_7], %9 {strides = array<i32>} : memref<40x32xf32, #tpu.memory_space<vmem>>, vector<8x32xf32>,
    %11 = vector.extract_strided_slice %1 {offsets = [24, 0], sizes = [16, 16], strides = [1, 1]} : vector<56x16xf32> to vector<16x16xf32>
    %12 = vector.extract_strided_slice %2 {offsets = [32, 0], sizes = [16, 32], strides = [1, 1]} : vector<65x32xf32> to vector<16x32xf32>
    %cst_8 = arith.constant dense<0.000000e+00> : vector<16x32xf32>
    %13 = tpu.matmul %11, %12, %cst_8 {dimension_numbers = #tpu.dot_dimension_numbers<[1], [0], [0], [1], [0, 0, 1, 1], [], []>} : vector<16x16xf32>, vector<16x32xf32>, vector<16x32xf32> -> vector<16x32xf32>
    %c24 = arith.constant 24 : index
    %c0_9 = arith.constant 0 : index
    %14 = vector.load %arg6[%c24, %c0_9] : memref<40x32xf32, #tpu.memory_space<vmem>>, vector<16x32xf32>
    tpu.vector_store %arg6[%c24, %c0_9], %13 {strides = array<i32>} : memref<40x32xf32, #tpu.memory_space<vmem>>, vector<16x32xf32>,
    %c0_10 = arith.constant 0 : index
    %c0_11 = arith.constant 0 : index
    %c0_12 = arith.constant 0 : index
    %15 = vector.load %arg1[%c0_10, %c0_11, %c0_12] : memref<1x16x40xf32, #tpu.memory_space<vmem>>, vector<1x16x40xf32>
    %16 = vector.shape_cast %15 : vector<1x16x40xf32> to vector<16x40xf32>
    %c0_13 = arith.constant 0 : index
    %c0_14 = arith.constant 0 : index
    %17 = vector.load %arg6[%c0_13, %c0_14] : memref<40x32xf32, #tpu.memory_space<vmem>>, vector<40x32xf32>
    %cst_15 = arith.constant dense<0.000000e+00> : vector<16x32xf32>
    %18 = tpu.matmul %16, %17, %cst_15 {dimension_numbers = #tpu.dot_dimension_numbers<[1], [0], [0], [1], [0, 0, 1, 1], [], []>} : vector<16x40xf32>, vector<40x32xf32>, vector<16x32xf32> -> vector<16x32xf32>
    %19 = vector.extract_strided_slice %1 {offsets = [40, 0], sizes = [16, 16], strides = [1, 1]} : vector<56x16xf32> to vector<16x16xf32>
    %20 = vector.extract_strided_slice %2 {offsets = [48, 0], sizes = [16, 32], strides = [1, 1]} : vector<65x32xf32> to vector<16x32xf32>
    %cst_16 = arith.constant dense<0.000000e+00> : vector<16x32xf32>
    %21 = tpu.matmul %19, %20, %cst_16 {dimension_numbers = #tpu.dot_dimension_numbers<[1], [0], [0], [1], [0, 0, 1, 1], [], []>} : vector<16x16xf32>, vector<16x32xf32>, vector<16x32xf32> -> vector<16x32xf32>
    %22 = arith.addf %18, %21 : vector<16x32xf32>
    %23 = vector.extract_strided_slice %2 {offsets = [64, 0], sizes = [1, 32], strides = [1, 1]} : vector<65x32xf32> to vector<1x32xf32>
    %24 = vector.broadcast %23 : vector<1x32xf32> to vector<16x32xf32>
    %25 = arith.addf %22, %24 : vector<16x32xf32>
    %cst_17 = arith.constant 0.000000e+00 : f32
    %26 = vector.broadcast %cst_17 : f32 to vector<16x32xf32>
    %27 = arith.maximumf %25, %26 : vector<16x32xf32>
    %c0_18 = arith.constant 0 : index
    %c0_19 = arith.constant 0 : index
    %28 = vector.load %arg4[%c0_18, %c0_19] : memref<33x128xf32, #tpu.memory_space<vmem>>, vector<32x128xf32>
    %cst_20 = arith.constant dense<0.000000e+00> : vector<16x128xf32>
    %29 = tpu.matmul %27, %28, %cst_20 {dimension_numbers = #tpu.dot_dimension_numbers<[1], [0], [0], [1], [0, 0, 1, 1], [], []>} : vector<16x32xf32>, vector<32x128xf32>, vector<16x128xf32> -> vector<16x128xf32>
    %c32 = arith.constant 32 : index
    %c0_21 = arith.constant 0 : index
    %30 = vector.load %arg4[%c32, %c0_21] : memref<33x128xf32, #tpu.memory_space<vmem>>, vector<1x128xf32>
    %31 = vector.broadcast %30 : vector<1x128xf32> to vector<16x128xf32>
    %32 = arith.addf %29, %31 : vector<16x128xf32>
    %c0_22 = arith.constant 0 : index
    %c0_23 = arith.constant 0 : index
    %c0_24 = arith.constant 0 : index
    %33 = vector.load %arg5[%c0_22, %c0_23, %c0_24] : memref<1x16x128xf32, #tpu.memory_space<vmem>>, vector<1x16x128xf32>
    %34 = vector.shape_cast %33 : vector<1x16x128xf32> to vector<16x128xf32>
    %35 = vector.shape_cast %32 : vector<16x128xf32> to vector<1x16x128xf32>
    tpu.vector_store %arg5[%c0_22, %c0_23, %c0_24], %35 {strides = array<i32>} : memref<1x16x128xf32, #tpu.memory_space<vmem>>, vector<1x16x128xf32>,
    return
  }
  func.func @transform_0(%arg0: i32) -> (i32, i32, i32) {
    %c0_i32 = arith.constant 0 : i32
    %c0_i32_0 = arith.constant 0 : i32
    %c0_i32_1 = arith.constant 0 : i32
    return %arg0, %c0_i32, %c0_i32_0 : i32, i32, i32
  }
  func.func @transform_1(%arg0: i32) -> (i32, i32, i32) {
    %c0_i32 = arith.constant 0 : i32
    %c0_i32_0 = arith.constant 0 : i32
    %c0_i32_1 = arith.constant 0 : i32
    return %arg0, %c0_i32, %c0_i32_0 : i32, i32, i32
  }
  func.func @transform_2(%arg0: i32) -> (i32, i32) {
    %c0_i32 = arith.constant 0 : i32
    %c0_i32_0 = arith.constant 0 : i32
    %c0_i32_1 = arith.constant 0 : i32
    return %c0_i32, %c0_i32_0 : i32, i32
  }
  func.func @transform_3(%arg0: i32) -> (i32, i32) {
    %c0_i32 = arith.constant 0 : i32
    %c0_i32_0 = arith.constant 0 : i32
    %c0_i32_1 = arith.constant 0 : i32
    return %c0_i32, %c0_i32_0 : i32, i32
  }
  func.func @transform_4(%arg0: i32) -> (i32, i32, i32) {
    %c0_i32 = arith.constant 0 : i32
    %c0_i32_0 = arith.constant 0 : i32
    %c0_i32_1 = arith.constant 0 : i32
    return %arg0, %c0_i32, %c0_i32_0 : i32, i32, i32
  }
}

</mosaic_0001>

<bundles_post_ra>
// kernel: hetero_gnn_forward.1
= control target key start
LH: loop header
LB: loop body
LE: loop exit
PB: predicated region body
PF: predicated region fallthrough
CT: control target
= control target key end

     0   :  { %s966_s15 = smov 0   ;;  %s1052_s0 = inlined_call_operand.vmem [shape: f32[4,16,40], index: 0, kind: input, shape index: {}]   ;;  %s1053_s1 = inlined_call_operand.vmem [shape: f32[4,56,16], index: 1, kind: input, shape index: {}]   ;;  %s1054_s2 = inlined_call_operand.vmem [shape: f32[65,32], index: 2, kind: input, shape index: {}]   ;;  %s1055_s3 = inlined_call_operand.vmem [shape: f32[33,128], index: 3, kind: input, shape index: {}]   ;;  %s1056_s4 = inlined_call_operand.vmem [shape: f32[4,16,128], index: 4, kind: output, shape index: {}]  }
   0x1 LB: > { %s813_s16 = sadd.s32 4294967295, %s937_s15   ;;  %p817_p0 = scmp.ge.s32.totalorder %s937_s15, 1  ;;  %s937_s15 = sphi %s966_s15, %s14_s15  }
   0x2   : > { %p172_p1 = scmp.lt.s32.totalorder %s937_s15, 5 }
   0x4   : > { %p173_p2 = pnand %p817_p0, %p172_p1 }
   0x5   : > { %p203_p3 = scmp.lt.s32.totalorder (!%p173_p2), %s813_s16, 3 }
   0x6   : > { %176 = sbr.rel (%p173_p2) target bundleno = 633 (0x279), region = 36 }
   0xb   : > { %v226_v0 = vld [vmem:[%s1054_s2 + $0x8] sm:$0xff]  ;;  %v225_v1 = vld [vmem:[%s1054_s2] sm:$0xff]  ;;  %v939_v2 = vmov 0.0   ;;  %v228_v3 = vld [vmem:[%s1054_s2 + $0x18] sm:$0xff]  ;;  %s1058_s16 = smov (!%p203_p3, %s813_s16), 3  ;;  %vm234_vm0 = vcmask 130048  }
   0xc   : > { %868 = vmatprep.subr.mxu0 %v226_v0  ;;  %875 = vmatprep.subr.mxu1 %v939_v2  ;;  %v227_v4 = vld [vmem:[%s1054_s2 + $0x10] sm:$0xff]  ;;  %v230_v5 = vld [vmem:[%s1054_s2 + $0x28] sm:$0xff]  ;;  %s920_s27 = smul.u32 56, %s1058_s16  ;;  %vm940_vm1 = vmmov 0   ;;  %v229_v9 = vld [vmem:[%s1054_s2 + $0x20] sm:$0xff]  ;;  %s838_s11 = sshll.u32 %s1058_s16, 4 }
   0xd   : > { %869 = vmatpush3.msra.mxu0 %v226_v0  ;;  %876 = vmatpush3.msra.mxu1 %v228_v3  ;;  %v232_v12 = vld [vmem:[%s1054_s2 + $0x38] sm:$0xff]  ;;  %v231_v13 = vld [vmem:[%s1054_s2 + $0x30] sm:$0xff]  ;;  %s207_s14 = scalar_lea.vmem %s1052_s0, %s838_s11  ;;  %vm564_vm2 = vcmask 326656   ;;  %vm316_vm3 = vcmask 261120   ;;  %v655_v31 = vld [vmem:[%s1055_s3 + $0x8] sm:$0xff]  ;;  %s217_s5 = scalar_lea.vmem %s1056_s4, %s838_s11 }
   0xe   : > { %870 = vmatprep.subr.mxu0 %v225_v1  ;;  %877 = vmatprep.subr.mxu1 %v939_v2  ;;  %s212_s30 = scalar_lea.vmem %s1053_s1, %s920_s27  ;;  %v476_v16 = vld [vmem:[%s207_s14] sm:$0xff]  ;;  %v477_v28 = vld [vmem:[%s207_s14 + $0x8] sm:$0xff]  ;;  %v657_v29 = vld [vmem:[%s1055_s3 + $0x18] sm:$0xff] }
   0xf   : > { %871 = vmatpush3.msra.mxu0 %v225_v1  ;;  %878 = vmatpush3.msra.mxu1 %v227_v4  ;;  %v218_v6 = vld [vmem:[%s212_s30] sm:$0xff]  ;;  %v219_v7 = vld [vmem:[%s212_s30 + $0x8] sm:$0xff]  ;;  %v221_v8 = vld [vmem:[%s212_s30 + $0x18] sm:$0xff] }
  0x10   : > { %882 = vmatprep.subr.mxu0 %v230_v5  ;;  %879 = vmatprep.mubr.msk.f32.mxu1 %vm940_vm1, %v939_v2  ;;  %v220_v10 = vld [vmem:[%s212_s30 + $0x10] sm:$0xff]  ;;  %v222_v11 = vld [vmem:[%s212_s30 + $0x20] sm:$0xff]  ;;  %v223_v14 = vld [vmem:[%s212_s30 + $0x28] sm:$0xff] }
  0x11   : > { %872 = vmatprep.mubr.msk.f32.mxu0 %vm234_vm0, %v218_v6  ;;  %880 = vmatmul.mubr.msk.f32.vlgmr.msra.gmra.mxu1 %vm234_vm0, %v220_v10  ;;  %v224_v15 = vld [vmem:[%s212_s30 + $0x30] sm:$0xff]  ;;  %v654_v32 = vld [vmem:[%s1055_s3] sm:$0xff] }
  0x12   : > { %873 = vmatmul.mubr.msk.f32.vlgmr.msra.gmra.mxu0 %vm234_vm0, %v219_v7  ;;  %889 = vmatprep.subr.mxu1 %v232_v12  ;;  %v656_v30 = vld [vmem:[%s1055_s3 + $0x10] sm:$0xff]  ;;  %v832_v35 = vld [vmem:[%s1054_s2 + $0x40] ss:$0 sm:$0xff] }
  0x13   : > { %883 = vmatpush3.msra.mxu0 %v230_v5  ;;  %886 = vmatprep.mubr.msk.f32.mxu0 %vm234_vm0, %v221_v8  ;;  %v833_v44 = vld [vmem:[%s1055_s3 + $0x20] ss:$0 sm:$0xff] }
  0x14   : > { %884 = vmatprep.subr.mxu0 %v229_v9  ;;  %890 = vmatpush3.msra.mxu1 %v232_v12 }
  0x15   : > { %885 = vmatpush3.msra.mxu0 %v229_v9  ;;  %891 = vmatprep.subr.mxu1 %v231_v13 }
  0x16   : > { %887 = vmatmul.mubr.msk.f32.vlgmr.msra.gmra.mxu0 %vm234_vm0, %v222_v11  ;;  %892 = vmatpush3.msra.mxu1 %v231_v13 }
  0x17   : > { %893 = vmatprep.mubr.msk.f32.mxu1 %vm234_vm0, %v223_v14  ;;  %906 = vmatprep.mubr.msk.f32.mxu0 %vm564_vm2, %v476_v16 }
  0x18   : > { %894 = vmatmul.mubr.msk.f32.vlgmr.msra.gmra.mxu1 %vm234_vm0, %v224_v15  ;;  %909 = vmatprep.subr.mxu1 %v657_v29 }
  0x19   : > { %910 = vmatpush3.msra.mxu1 %v657_v29 }
  0x1a   : > { %911 = vmatprep.subr.mxu1 %v656_v30 }
  0x1b   : > { %912 = vmatpush3.msra.mxu1 %v656_v30 }
  0x1c   : > { %913 = vmatprep.subr.mxu1 %v655_v31 }
  0x1d   : > { %914 = vmatpush3.msra.mxu1 %v655_v31 }
  0x1e   : > { %915 = vmatprep.subr.mxu1 %v654_v32 }
  0x1f   : > { %916 = vmatpush3.msra.mxu1 %v654_v32 }
  0xd1   : > { %v388_v18 = vpop.f32.mrf.mxu1 }
  0xd2   : > { %v874_v17 = vpop.f32.mrf.mxu0  ;;  %392 = vst.msk [vmem:[#allocation2 + $0x10] sm:$0xff] %vm316_vm3, %v388_v18 }
  0xd3   : > { %318 = vst.msk [vmem:[#allocation2 + $0x8] sm:$0xff] %vm316_vm3, %v874_v17  ;;  %v881_v20 = vpop.f32.mrf.mxu1 }
  0xd4   : > { %v307_v19 = vpop.f32.mrf.mxu0 }
  0xd5   : > { %317 = vst.msk [vmem:[#allocation2] sm:$0xff] %vm316_vm3, %v307_v19 }
  0xd6   : > { %v888_v21 = vpop.f32.mrf.mxu0 }
  0xd7   : > { %475 = vst.msk [vmem:[#allocation2 + $0x20] sm:$0xff] %vm316_vm3, %v888_v21 }
  0xd8   : > { %v465_v22 = vpop.f32.mrf.mxu0  ;;  %v895_v33 = vpop.f32.mrf.mxu1 }
  0xd9   : > { %474 = vst.msk [vmem:[#allocation2 + $0x18] sm:$0xff] %vm316_vm3, %v465_v22  ;;  %v480_v25 = vld [vmem:[#allocation2 + $0x10] sm:$0xff] }
  0xda   : > { %v479_v26 = vld [vmem:[#allocation2 + $0x8] sm:$0xff]  ;;  %v555_v37 = vpop.f32.mrf.mxu1 }
  0xdc   : > { %v478_v27 = vld [vmem:[#allocation2] sm:$0xff] }
  0xde   : > { %v482_v23 = vld [vmem:[#allocation2 + $0x20] sm:$0xff] }
  0xdf   : > { %896 = vmatprep.subr.mxu0 %v482_v23 }
  0xe0   : > { %897 = vmatpush3.msra.mxu0 %v482_v23  ;;  %v481_v24 = vld [vmem:[#allocation2 + $0x18] sm:$0xff] }
  0xe1   : > { %898 = vmatprep.subr.mxu0 %v481_v24 }
  0xe2   : > { %899 = vmatpush3.msra.mxu0 %v481_v24 }
  0xe3   : > { %900 = vmatprep.subr.mxu0 %v480_v25 }
  0xe4   : > { %901 = vmatpush3.msra.mxu0 %v480_v25 }
  0xe5   : > { %902 = vmatprep.subr.mxu0 %v479_v26 }
  0xe6   : > { %903 = vmatpush3.msra.mxu0 %v479_v26 }
  0xe7   : > { %904 = vmatprep.subr.mxu0 %v478_v27 }
  0xe8   : > { %905 = vmatpush3.msra.mxu0 %v478_v27 }
  0xe9   : > { %907 = vmatmul.mubr.msk.f32.vlgmr.msra.gmra.mxu0 %vm564_vm2, %v477_v28 }
 0x1a9   : > { %v908_v34 = vpop.f32.mrf.mxu0 }
 0x1aa   : > { %v643_v36 = vadd.f32 %v908_v34, %v895_v33 }
 0x1ab   : > { %v637_v38 = vpop.f32.mrf.mxu0 }
 0x1ac   : > { %v638_v39 = vadd.f32 %v637_v38, %v555_v37  ;;  %v651_v40 = vadd.f32 %v832_v35, %v643_v36 }
 0x1ae   : > { %v650_v41 = vadd.f32 %v832_v35, %v638_v39  ;;  %v653_v43 = vmax.f32 %v651_v40, 0.0 }
 0x1b0   : > { %v652_v42 = vmax.f32 %v650_v41, 0.0 }
 0x1b2   : > { %917 = vmatprep.mubr.msk.f32.mxu1 %vm316_vm3, %v652_v42 }
 0x1b3   : > { %918 = vmatmul.mubr.msk.f32.vlgmr.msra.gmra.mxu1 %vm316_vm3, %v653_v43 }
 0x273   : > { %v919_v45 = vpop.f32.mrf.mxu1 }
 0x274   : > { %v741_v46 = vadd.f32 %v919_v45, %v833_v44 }
 0x275   : > { %v735_v47 = vpop.f32.mrf.mxu1 }
 0x276   : > { %745 = vst [vmem:[%s217_s5 + $0x8] sm:$0xff] %v741_v46  ;;  %v736_v48 = vadd.f32 %v833_v44, %v735_v47 }
 0x278   : > { %744 = vst [vmem:[%s217_s5] sm:$0xff] %v736_v48 }
 0x279 PF: > { %s14_s15 = sadd.s32 1, %s937_s15  }
 0x27a   : > { %p11_p4 = scmp.ge.s32.totalorder %s14_s15, 6  }
 0x27c   :  { %13 = sbr.rel (!%p11_p4) target bundleno = 1 (0x1), region = 69 }

</bundles_post_ra>
